<compile_context>
chip_gen: v7x
topology: tpu7x:2x2x1
jax: 0.10.0
libtpu: 0.0.40
codegen_flags: <defaults>
</compile_context>

<pallas_src>
import jax
import jax.numpy as jnp
from jax import lax
from jax.experimental import pallas as pl
from jax.experimental.pallas import tpu as pltpu

# dataset_config from the reference script
SCENE_RANGE = 1.4
CAMERA_FLIPPED = True
WHITE_BACKGROUND = False

OUT_ROWS = 8  # fused output rows: [r, g, b, depth, mask, pad, pad, pad]


def _round_up(x, m):
    return ((x + m - 1) // m) * m


# ----------------------------------------------------------------------------
# Pallas kernel: radiance-field MLP + volume rendering for one tile of rays
# ----------------------------------------------------------------------------
def _render_kernel(d_ref, z_ref, blat_ref, wd_ref, wh_ref, bh_ref, out_ref):
    D = z_ref.shape[1]
    TR = z_ref.shape[2]
    HID = blat_ref.shape[1]
    f32 = jnp.float32

    d3 = d_ref[0]                                   # (3, TR)   ray dirs
    z = z_ref[0]                                    # (D, TR)   depth values
    blat = blat_ref[0]                              # (HID, 1)  w1@o + b1 + lat
    wd = wd_ref[...]                                # (HID, 3)
    wh = wh_ref[...]                                # (4D, D*HID) block-diag head
    bh = bh_ref[...]                                # (4D, 1)

    # first-layer "direction" matmul, hoisted out of the depth dimension.
    # K=3 -> cheap VPU outer-product sum instead of a tiny MXU matmul.
    hd = (wd[:, 0:1] * d3[0:1, :]
          + wd[:, 1:2] * d3[1:2, :]
          + wd[:, 2:3] * d3[2:3, :])                # (HID, TR)

    # hidden activations for all depths, depth stacked on the sublane axis.
    pre = blat[None, :, :] + hd[None, :, :] * z[:, None, :]   # (D, HID, TR)
    h_stack = jnp.maximum(pre, 0.0).reshape(D * HID, TR)      # (D*HID, TR)

    # one wide head matmul: rows 0..D-1 sigma(d), D..2D-1 r(d), 2D..3D-1 g(d),
    # 3D..4D-1 b(d)
    out_all = jnp.dot(wh, h_stack, preferred_element_type=f32) + bh  # (4D, TR)

    sigma = jnp.maximum(out_all[0:D, :], 0.0)                 # (D, TR)
    rgb_s = jax.nn.sigmoid(out_all[D:4 * D, :])               # (3D, TR)

    # dist[d] = z[d+1] - z[d] (clamped >= 0), last = 1e10, via a tiny matmul.
    ii = lax.broadcasted_iota(jnp.int32, (D, D), 0)
    jj = lax.broadcasted_iota(jnp.int32, (D, D), 1)
    dmat = ((jj == ii + 1).astype(f32)
            - ((jj == ii) & (ii < D - 1)).astype(f32))        # (D, D)
    zdiff = jnp.dot(dmat, z, preferred_element_type=f32)      # (D, TR)
    row = lax.broadcasted_iota(jnp.int32, (D, TR), 0)
    dist = jnp.where(row == D - 1, 1e10, jnp.maximum(zdiff, 0.0))

    # volume rendering weights, vectorized over depth on sublanes
    ex = jnp.exp(-sigma * dist)                               # (D, TR)
    alpha = 1.0 - ex
    om = ex + 1e-10                                           # 1 - alpha + eps
    ltri = (jj < ii).astype(f32)                              # strict lower tri
    # exclusive cumprod along depth = exp(strict-lower-tri @ log(om))
    trans = jnp.exp(jnp.dot(ltri, jnp.log(om),
                            preferred_element_type=f32))      # (D, TR)
    w = alpha * trans                                         # (D, TR)

    wr = jnp.broadcast_to(w[None, :, :], (3, D, TR))
    rgb_acc = jnp.sum(wr * rgb_s.reshape(3, D, TR), axis=1)   # (3, TR)
    dep_acc = jnp.sum(w * z, axis=0, keepdims=True)           # (1, TR)
    msk_acc = jnp.sum(w, axis=0, keepdims=True)               # (1, TR)

    # fused lane-dense output slab: one block, one output DMA per grid step
    out_ref[0, 0:3, :] = rgb_acc
    out_ref[0, 3:4, :] = dep_acc
    out_ref[0, 4:5, :] = msk_acc
    out_ref[0, 5:8, :] = jnp.zeros((3, TR), f32)


def pallas_render_rays(d3, zs, blat, wd, wh, bh, *, tile_rays=512):
    """d3: (B,3,HW), zs: (B,D,HW), blat: (B,HID,1); weights small."""
    B, _, HW = d3.shape
    D = zs.shape[1]
    HID = blat.shape[1]

    # lane-dense tiling: tile width multiple of 128, HW padded to a multiple
    tr = _round_up(min(tile_rays, HW), 128)
    hw_pad = _round_up(HW, tr)
    if hw_pad != HW:
        pad = hw_pad - HW
        d3 = jnp.pad(d3, ((0, 0), (0, 0), (0, pad)))
        zs = jnp.pad(zs, ((0, 0), (0, 0), (0, pad)))
    n_t = hw_pad // tr

    grid_spec = pltpu.PrefetchScalarGridSpec(
        num_scalar_prefetch=0,
        grid=(B, n_t),
        in_specs=[
            pl.BlockSpec((1, 3, tr), lambda b, i: (b, 0, i)),          # dirs
            pl.BlockSpec((1, D, tr), lambda b, i: (b, 0, i)),          # z
            pl.BlockSpec((1, HID, 1), lambda b, i: (b, 0, 0)),         # bias
            pl.BlockSpec((HID, 3), lambda b, i: (0, 0)),               # w1_xyz^T
            pl.BlockSpec((4 * D, D * HID), lambda b, i: (0, 0)),       # head W
            pl.BlockSpec((4 * D, 1), lambda b, i: (0, 0)),             # head b
        ],
        out_specs=pl.BlockSpec((1, OUT_ROWS, tr), lambda b, i: (b, 0, i)),
    )

    out = pl.pallas_call(
        _render_kernel,
        grid_spec=grid_spec,
        out_shape=jax.ShapeDtypeStruct((B, OUT_ROWS, hw_pad), jnp.float32),
        compiler_params=pltpu.CompilerParams(
            dimension_semantics=("parallel", "parallel"),
            vmem_limit_bytes=32 * 1024 * 1024),
    )(d3, zs, blat, wd, wh, bh)
    return out[:, :, :HW]


# ----------------------------------------------------------------------------
# Plain-JAX glue: channel-major ray bundle, near/far planes, depth samples
# ----------------------------------------------------------------------------
def get_ray_bundle_cm(height, width, focal, c2w, center):
    # TODO(synk): bbox-based ray cropping of nerf_utils.get_ray_bundle is not
    # reproduced (bbox covers the full image here).
    iig, jjg = jnp.meshgrid(jnp.arange(width, dtype=jnp.float32),
                            jnp.arange(height, dtype=jnp.float32),
                            indexing="xy")
    iif = iig.reshape(-1)                                      # (HW,)
    jjf = jjg.reshape(-1)
    cx = center[:, 0:1]
    cy = center[:, 1:2]
    f = focal[:, None]
    x = (iif[None, :] - width * 0.5 + cx) / f                  # (B, HW)
    y = -(jjf[None, :] - height * 0.5 + cy) / f
    zc = -jnp.ones_like(x)
    dirs_cam = jnp.stack([x, y, zc], axis=1)                   # (B, 3, HW)
    if CAMERA_FLIPPED:
        dirs_cam = dirs_cam * jnp.array([-1.0, 1.0, 1.0],
                                        jnp.float32)[None, :, None]
    ray_d = jnp.einsum("bkc,bcn->bkn", c2w[:, :3, :3], dirs_cam)  # (B, 3, HW)
    ray_o = c2w[:, :3, 3]                                      # (B, 3) per image
    return ray_o, ray_d


def compute_near_far_planes(ray_o, scene_range):
    o_norm = jnp.linalg.norm(ray_o, axis=-1)                   # (B,)
    near = jnp.maximum(o_norm - scene_range, 0.05)
    far = o_norm + scene_range
    return near, far


def compute_depth_values(near, far, n_samples, hw, key, randomize=True):
    t = jnp.linspace(0.0, 1.0, n_samples, dtype=jnp.float32)   # (D,)
    base = (near[:, None, None]
            + (far - near)[:, None, None] * t[None, :, None])  # (B, D, 1)
    B = near.shape[0]
    if randomize:
        bin_w = (far - near)[:, None, None] / n_samples
        z = base + jax.random.uniform(key, (B, n_samples, hw),
                                      jnp.float32) * bin_w
    else:
        z = jnp.broadcast_to(base, (B, n_samples, hw))
    return z                                                    # (B, D, HW)


# ----------------------------------------------------------------------------
# ParallelModel equivalent
# ----------------------------------------------------------------------------
class ParallelModelPallas:
    def __init__(self, resolution, params, depth_samples_per_ray=8,
                 tile_rays=512):
        self.resolution = resolution
        self.params = params
        self.depth_samples_per_ray = depth_samples_per_ray
        self.tile_rays = tile_rays

    def __call__(self, tform_cam2world, focal, center, bbox, c,
                 ray_multiplier=1, res_multiplier=1, randomize=True,
                 rng=None):
        # TODO(synk): use_ema / pretrain_sdf / encoder_output / closure /
        # fine_sampling / normals / semantics / viewdir branches of the
        # original forward depend on an unspecified external model and are not
        # reproduced.
        if rng is None:
            rng = jax.random.PRNGKey(0)
        H = W = int(self.resolution * res_multiplier)
        D = self.depth_samples_per_ray * ray_multiplier
        B = tform_cam2world.shape[0]
        HW = H * W

        ray_o, ray_d = get_ray_bundle_cm(H, W, focal, tform_cam2world, center)
        ray_d = ray_d / (jnp.linalg.norm(ray_d, axis=1, keepdims=True) + 1e-12)
        near, far = compute_near_far_planes(ray_o, SCENE_RANGE)
        z = compute_depth_values(near, far, D, HW, rng, randomize=randomize)

        p = self.params
        HID = p["w1"].shape[1]

        # ray origins are constant per image -> fold w1_xyz @ o into the
        # per-image bias together with the latent conditioning and b1
        blat = (ray_o @ p["w1"] + p["b1"] + c @ p["w_lat"]).astype(jnp.float32)
        blat = blat.reshape(B, HID, 1)

        wd = p["w1"].T.astype(jnp.float32)                      # (HID, 3)

        # block-diagonal head: rows 0..D-1 sigma, D..2D-1 r, 2D..3D-1 g,
        # 3D..4D-1 b; column block d holds the weights applied to h at depth d
        head_small = jnp.concatenate([p["w_sigma"], p["w_rgb"].T],
                                     axis=0).astype(jnp.float32)   # (4, HID)
        wh = jnp.einsum("ch,de->cdeh", head_small,
                        jnp.eye(D, dtype=jnp.float32)).reshape(4 * D, D * HID)
        b_small = jnp.concatenate([p["b_sigma"], p["b_rgb"].T],
                                  axis=0).astype(jnp.float32)      # (4, 1)
        bh = jnp.broadcast_to(b_small[:, None, :], (4, D, 1)).reshape(4 * D, 1)

        out = pallas_render_rays(ray_d.astype(jnp.float32),
                                 z.astype(jnp.float32),
                                 blat, wd, wh, bh,
                                 tile_rays=self.tile_rays)          # (B, 8, HW)

        rgb_pred = jnp.transpose(out[:, 0:3, :], (0, 2, 1)).reshape(B, H, W, 3)
        depth_pred = out[:, 3, :].reshape(B, H, W)
        mask_pred = out[:, 4, :].reshape(B, H, W)
        if WHITE_BACKGROUND:
            rgb_pred = rgb_pred + (1.0 - mask_pred[..., None])
        # (rgb, depth, mask, normals, semantics, model_outputs)
        return rgb_pred, depth_pred, mask_pred, None, None, {}


def init_params(key, hid=32, lat=16):
    k1, k2, k3, k4 = jax.random.split(key, 4)
    return {
        "w1": jax.random.normal(k1, (3, hid), jnp.float32) * 0.5,
        "b1": jnp.zeros((1, hid), jnp.float32),
        "w_sigma": jax.random.normal(k2, (1, hid), jnp.float32) * 0.3,
        "b_sigma": jnp.full((1, 1), 0.1, jnp.float32),
        "w_rgb": jax.random.normal(k3, (hid, 3), jnp.float32) * 0.3,
        "b_rgb": jnp.zeros((1, 3), jnp.float32),
        "w_lat": jax.random.normal(k4, (lat, hid), jnp.float32) * 0.1,
    }


if __name__ == "__main__":
    key = jax.random.PRNGKey(0)
    kp, kc, kn = jax.random.split(key, 3)

    B, RES, D, HID, LAT = 2, 8, 8, 32, 16
    params = init_params(kp, hid=HID, lat=LAT)
    model = ParallelModelPallas(RES, params, depth_samples_per_ray=D)

    # deterministic example camera inputs
    c2w = jnp.tile(jnp.eye(4, dtype=jnp.float32)[None], (B, 1, 1))
    c2w = c2w.at[:, 2, 3].set(jnp.array([2.5, 3.0], jnp.float32))
    focal = jnp.array([10.0, 12.0], jnp.float32)
    center = jnp.zeros((B, 2), jnp.float32)
    bbox = jnp.tile(jnp.array([0.0, 0.0, float(RES), float(RES)],
                              jnp.float32)[None], (B, 1))
    c = jax.random.normal(kc, (B, LAT), jnp.float32)

    rgb, depth, mask, normals, semantics, extra = model(
        c2w, focal, center, bbox, c, rng=kn)
    jax.block_until_ready((rgb, depth, mask))

    assert rgb.shape == (B, RES, RES, 3)
    assert depth.shape == (B, RES, RES)
    assert mask.shape == (B, RES, RES)
    assert bool(jnp.all(jnp.isfinite(rgb)))
    assert bool(jnp.all(jnp.isfinite(depth)))
    assert bool(jnp.all(jnp.isfinite(mask)))
    print("KERNEL_OK")
</pallas_src>

<mosaic_0001>
module attributes {stable_mosaic.version = 11 : i64} {
  func.func @_render_kernel(%arg0: i32, %arg1: i32, %arg2: memref<1x3x128xf32, #tpu.memory_space<vmem>>, %arg3: memref<1x8x128xf32, #tpu.memory_space<vmem>>, %arg4: memref<1x32x1xf32, #tpu.memory_space<vmem>>, %arg5: memref<32x3xf32, #tpu.memory_space<vmem>>, %arg6: memref<32x256xf32, #tpu.memory_space<vmem>>, %arg7: memref<32x1xf32, #tpu.memory_space<vmem>>, %arg8: memref<1x8x128xf32, #tpu.memory_space<vmem>>) attributes {dimension_semantics = [#tpu.dimension_semantics<parallel>, #tpu.dimension_semantics<parallel>], iteration_bounds = array<i64: 2, 1>, scalar_prefetch = 0 : i64, scratch_operands = 0 : i64, tpu.core_type = #tpu.core_type<tc>, window_params = [{transform_indices = @transform_0, window_bounds = array<i64: 1, 3, 128>}, {transform_indices = @transform_1, window_bounds = array<i64: 1, 8, 128>}, {transform_indices = @transform_2, window_bounds = array<i64: 1, 32, 1>}, {pipeline_mode = #tpu.pipeline_mode<synchronous>, transform_indices = @transform_3, window_bounds = array<i64: 32, 3>}, {pipeline_mode = #tpu.pipeline_mode<synchronous>, transform_indices = @transform_4, window_bounds = array<i64: 32, 256>}, {pipeline_mode = #tpu.pipeline_mode<synchronous>, transform_indices = @transform_5, window_bounds = array<i64: 32, 1>}, {transform_indices = @transform_6, window_bounds = array<i64: 1, 8, 128>}]} {
    %c0 = arith.constant 0 : index
    %c0_0 = arith.constant 0 : index
    %c0_1 = arith.constant 0 : index
    %0 = vector.load %arg2[%c0, %c0_0, %c0_1] : memref<1x3x128xf32, #tpu.memory_space<vmem>>, vector<1x3x128xf32>
    %1 = vector.shape_cast %0 : vector<1x3x128xf32> to vector<3x128xf32>
    %c0_2 = arith.constant 0 : index
    %c0_3 = arith.constant 0 : index
    %c0_4 = arith.constant 0 : index
    %2 = vector.load %arg3[%c0_2, %c0_3, %c0_4] : memref<1x8x128xf32, #tpu.memory_space<vmem>>, vector<1x8x128xf32>
    %3 = vector.shape_cast %2 : vector<1x8x128xf32> to vector<8x128xf32>
    %c0_5 = arith.constant 0 : index
    %c0_6 = arith.constant 0 : index
    %c0_7 = arith.constant 0 : index
    %4 = vector.load %arg4[%c0_5, %c0_6, %c0_7] : memref<1x32x1xf32, #tpu.memory_space<vmem>>, vector<1x32x1xf32>
    %5 = vector.shape_cast %4 : vector<1x32x1xf32> to vector<32x1xf32>
    %c0_8 = arith.constant 0 : index
    %c0_9 = arith.constant 0 : index
    %6 = vector.load %arg5[%c0_8, %c0_9] : memref<32x3xf32, #tpu.memory_space<vmem>>, vector<32x3xf32>
    %c0_10 = arith.constant 0 : index
    %c0_11 = arith.constant 0 : index
    %7 = vector.load %arg6[%c0_10, %c0_11] : memref<32x256xf32, #tpu.memory_space<vmem>>, vector<32x256xf32>
    %c0_12 = arith.constant 0 : index
    %c0_13 = arith.constant 0 : index
    %8 = vector.load %arg7[%c0_12, %c0_13] : memref<32x1xf32, #tpu.memory_space<vmem>>, vector<32x1xf32>
    %9 = vector.extract_strided_slice %6 {offsets = [0, 0], sizes = [32, 1], strides = [1, 1]} : vector<32x3xf32> to vector<32x1xf32>
    %10 = vector.extract_strided_slice %1 {offsets = [0, 0], sizes = [1, 128], strides = [1, 1]} : vector<3x128xf32> to vector<1x128xf32>
    %11 = vector.broadcast %9 : vector<32x1xf32> to vector<32x128xf32>
    %12 = vector.broadcast %10 : vector<1x128xf32> to vector<32x128xf32>
    %13 = arith.mulf %11, %12 : vector<32x128xf32>
    %14 = vector.extract_strided_slice %6 {offsets = [0, 1], sizes = [32, 1], strides = [1, 1]} : vector<32x3xf32> to vector<32x1xf32>
    %15 = vector.extract_strided_slice %1 {offsets = [1, 0], sizes = [1, 128], strides = [1, 1]} : vector<3x128xf32> to vector<1x128xf32>
    %16 = vector.broadcast %14 : vector<32x1xf32> to vector<32x128xf32>
    %17 = vector.broadcast %15 : vector<1x128xf32> to vector<32x128xf32>
    %18 = arith.mulf %16, %17 : vector<32x128xf32>
    %19 = arith.addf %13, %18 : vector<32x128xf32>
    %20 = vector.extract_strided_slice %6 {offsets = [0, 2], sizes = [32, 1], strides = [1, 1]} : vector<32x3xf32> to vector<32x1xf32>
    %21 = vector.extract_strided_slice %1 {offsets = [2, 0], sizes = [1, 128], strides = [1, 1]} : vector<3x128xf32> to vector<1x128xf32>
    %22 = vector.broadcast %20 : vector<32x1xf32> to vector<32x128xf32>
    %23 = vector.broadcast %21 : vector<1x128xf32> to vector<32x128xf32>
    %24 = arith.mulf %22, %23 : vector<32x128xf32>
    %25 = arith.addf %19, %24 : vector<32x128xf32>
    %26 = vector.shape_cast %5 : vector<32x1xf32> to vector<1x32x1xf32>
    %27 = vector.shape_cast %25 : vector<32x128xf32> to vector<1x32x128xf32>
    %28 = vector.shape_cast %3 : vector<8x128xf32> to vector<8x1x128xf32>
    %29 = vector.broadcast %27 : vector<1x32x128xf32> to vector<8x32x128xf32>
    %30 = vector.broadcast %28 : vector<8x1x128xf32> to vector<8x32x128xf32>
    %31 = arith.mulf %29, %30 : vector<8x32x128xf32>
    %32 = vector.broadcast %26 : vector<1x32x1xf32> to vector<8x32x128xf32>
    %33 = arith.addf %32, %31 : vector<8x32x128xf32>
    %cst = arith.constant 0.000000e+00 : f32
    %34 = vector.broadcast %cst : f32 to vector<8x32x128xf32>
    %35 = arith.maximumf %33, %34 : vector<8x32x128xf32>
    %36 = vector.shape_cast %35 : vector<8x32x128xf32> to vector<256x128xf32>
    %cst_14 = arith.constant dense<0.000000e+00> : vector<32x128xf32>
    %37 = tpu.matmul %7, %36, %cst_14 {dimension_numbers = #tpu.dot_dimension_numbers<[1], [0], [0], [1], [0, 0, 1, 1], [], []>} : vector<32x256xf32>, vector<256x128xf32>, vector<32x128xf32> -> vector<32x128xf32>
    %38 = vector.broadcast %8 : vector<32x1xf32> to vector<32x128xf32>
    %39 = arith.addf %37, %38 : vector<32x128xf32>
    %40 = vector.extract_strided_slice %39 {offsets = [0, 0], sizes = [8, 128], strides = [1, 1]} : vector<32x128xf32> to vector<8x128xf32>
    %cst_15 = arith.constant 0.000000e+00 : f32
    %41 = vector.broadcast %cst_15 : f32 to vector<8x128xf32>
    %42 = arith.maximumf %40, %41 : vector<8x128xf32>
    %43 = vector.extract_strided_slice %39 {offsets = [8, 0], sizes = [24, 128], strides = [1, 1]} : vector<32x128xf32> to vector<24x128xf32>
    %44 = arith.negf %43 : vector<24x128xf32>
    %45 = math.exp %44 : vector<24x128xf32>
    %cst_16 = arith.constant 1.000000e+00 : f32
    %46 = vector.broadcast %cst_16 : f32 to vector<24x128xf32>
    %47 = arith.addf %46, %45 : vector<24x128xf32>
    %48 = arith.divf %46, %47 : vector<24x128xf32>
    %49 = tpu.iota {dimensions = array<i32: 0>} : vector<8x8xi32>
    %50 = tpu.iota {dimensions = array<i32: 1>} : vector<8x8xi32>
    %c1_i32 = arith.constant 1 : i32
    %51 = vector.broadcast %c1_i32 : i32 to vector<8x8xi32>
    %52 = arith.addi %49, %51 : vector<8x8xi32>
    %53 = arith.cmpi eq, %50, %52 : vector<8x8xi32>
    %54 = arith.extui %53 : vector<8x8xi1> to vector<8x8xi32>
    %55 = arith.sitofp %54 : vector<8x8xi32> to vector<8x8xf32>
    %56 = arith.cmpi eq, %50, %49 : vector<8x8xi32>
    %c7_i32 = arith.constant 7 : i32
    %57 = vector.broadcast %c7_i32 : i32 to vector<8x8xi32>
    %58 = arith.cmpi slt, %49, %57 : vector<8x8xi32>
    %59 = arith.andi %56, %58 : vector<8x8xi1>
    %60 = arith.extui %59 : vector<8x8xi1> to vector<8x8xi32>
    %61 = arith.sitofp %60 : vector<8x8xi32> to vector<8x8xf32>
    %62 = arith.subf %55, %61 : vector<8x8xf32>
    %cst_17 = arith.constant dense<0.000000e+00> : vector<8x128xf32>
    %63 = tpu.matmul %62, %3, %cst_17 {dimension_numbers = #tpu.dot_dimension_numbers<[1], [0], [0], [1], [0, 0, 1, 1], [], []>} : vector<8x8xf32>, vector<8x128xf32>, vector<8x128xf32> -> vector<8x128xf32>
    %64 = tpu.iota {dimensions = array<i32: 0>} : vector<8x128xi32>
    %c7_i32_18 = arith.constant 7 : i32
    %65 = vector.broadcast %c7_i32_18 : i32 to vector<8x128xi32>
    %66 = arith.cmpi eq, %64, %65 : vector<8x128xi32>
    %cst_19 = arith.constant 0.000000e+00 : f32
    %67 = vector.broadcast %cst_19 : f32 to vector<8x128xf32>
    %68 = arith.maximumf %63, %67 : vector<8x128xf32>
    %cst_20 = arith.constant 1.000000e+10 : f32
    %69 = vector.broadcast %cst_20 : f32 to vector<8x128xf32>
    %70 = arith.select %66, %69, %68 : vector<8x128xi1>, vector<8x128xf32>
    %cst_21 = arith.constant 0.000000e+00 : f32
    %71 = vector.broadcast %cst_21 : f32 to vector<8x128xf32>
    %72 = arith.subf %71, %42 : vector<8x128xf32>
    %73 = arith.mulf %72, %70 : vector<8x128xf32>
    %74 = math.exp %73 : vector<8x128xf32>
    %cst_22 = arith.constant 1.000000e+00 : f32
    %75 = vector.broadcast %cst_22 : f32 to vector<8x128xf32>
    %76 = arith.subf %75, %74 : vector<8x128xf32>
    %cst_23 = arith.constant 1.000000e-10 : f32
    %77 = vector.broadcast %cst_23 : f32 to vector<8x128xf32>
    %78 = arith.addf %74, %77 : vector<8x128xf32>
    %79 = arith.cmpi slt, %50, %49 : vector<8x8xi32>
    %80 = arith.extui %79 : vector<8x8xi1> to vector<8x8xi32>
    %81 = arith.sitofp %80 : vector<8x8xi32> to vector<8x8xf32>
    %82 = math.log %78 : vector<8x128xf32>
    %cst_24 = arith.constant dense<0.000000e+00> : vector<8x128xf32>
    %83 = tpu.matmul %81, %82, %cst_24 {dimension_numbers = #tpu.dot_dimension_numbers<[1], [0], [0], [1], [0, 0, 1, 1], [], []>} : vector<8x8xf32>, vector<8x128xf32>, vector<8x128xf32> -> vector<8x128xf32>
    %84 = math.exp %83 : vector<8x128xf32>
    %85 = arith.mulf %76, %84 : vector<8x128xf32>
    %86 = vector.shape_cast %85 : vector<8x128xf32> to vector<1x8x128xf32>
    %87 = vector.shape_cast %86 : vector<1x8x128xf32> to vector<1x8x128xf32>
    %88 = vector.broadcast %87 : vector<1x8x128xf32> to vector<3x8x128xf32>
    %89 = vector.shape_cast %48 : vector<24x128xf32> to vector<3x8x128xf32>
    %90 = arith.mulf %88, %89 : vector<3x8x128xf32>
    %cst_25 = arith.constant dense<0.000000e+00> : vector<3x128xf32>
    %91 = vector.multi_reduction <add>, %90, %cst_25 [1] : vector<3x8x128xf32> to vector<3x128xf32>
    %92 = arith.mulf %85, %3 : vector<8x128xf32>
    %cst_26 = arith.constant dense<0.000000e+00> : vector<128xf32>
    %93 = vector.multi_reduction <add>, %92, %cst_26 [0] : vector<8x128xf32> to vector<128xf32>
    %94 = vector.shape_cast %93 : vector<128xf32> to vector<1x128xf32>
    %cst_27 = arith.constant dense<0.000000e+00> : vector<128xf32>
    %95 = vector.multi_reduction <add>, %85, %cst_27 [0] : vector<8x128xf32> to vector<128xf32>
    %96 = vector.shape_cast %95 : vector<128xf32> to vector<1x128xf32>
    %c0_28 = arith.constant 0 : index
    %c0_29 = arith.constant 0 : index
    %c0_30 = arith.constant 0 : index
    %97 = vector.load %arg8[%c0_28, %c0_29, %c0_30] : memref<1x8x128xf32, #tpu.memory_space<vmem>>, vector<1x3x128xf32>
    %98 = vector.shape_cast %97 : vector<1x3x128xf32> to vector<3x128xf32>
    %99 = vector.shape_cast %91 : vector<3x128xf32> to vector<1x3x128xf32>
    tpu.vector_store %arg8[%c0_28, %c0_29, %c0_30], %99 {strides = array<i32>} : memref<1x8x128xf32, #tpu.memory_space<vmem>>, vector<1x3x128xf32>,
    %c0_31 = arith.constant 0 : index
    %c3 = arith.constant 3 : index
    %c0_32 = arith.constant 0 : index
    %100 = vector.load %arg8[%c0_31, %c3, %c0_32] : memref<1x8x128xf32, #tpu.memory_space<vmem>>, vector<1x1x128xf32>
    %101 = vector.shape_cast %100 : vector<1x1x128xf32> to vector<1x128xf32>
    %102 = vector.shape_cast %94 : vector<1x128xf32> to vector<1x1x128xf32>
    tpu.vector_store %arg8[%c0_31, %c3, %c0_32], %102 {strides = array<i32>} : memref<1x8x128xf32, #tpu.memory_space<vmem>>, vector<1x1x128xf32>,
    %c0_33 = arith.constant 0 : index
    %c4 = arith.constant 4 : index
    %c0_34 = arith.constant 0 : index
    %103 = vector.load %arg8[%c0_33, %c4, %c0_34] : memref<1x8x128xf32, #tpu.memory_space<vmem>>, vector<1x1x128xf32>
    %104 = vector.shape_cast %103 : vector<1x1x128xf32> to vector<1x128xf32>
    %105 = vector.shape_cast %96 : vector<1x128xf32> to vector<1x1x128xf32>
    tpu.vector_store %arg8[%c0_33, %c4, %c0_34], %105 {strides = array<i32>} : memref<1x8x128xf32, #tpu.memory_space<vmem>>, vector<1x1x128xf32>,
    %cst_35 = arith.constant 0.000000e+00 : f32
    %106 = vector.broadcast %cst_35 : f32 to vector<3x128xf32>
    %c0_36 = arith.constant 0 : index
    %c5 = arith.constant 5 : index
    %c0_37 = arith.constant 0 : index
    %107 = vector.load %arg8[%c0_36, %c5, %c0_37] : memref<1x8x128xf32, #tpu.memory_space<vmem>>, vector<1x3x128xf32>
    %108 = vector.shape_cast %107 : vector<1x3x128xf32> to vector<3x128xf32>
    %109 = vector.shape_cast %106 : vector<3x128xf32> to vector<1x3x128xf32>
    tpu.vector_store %arg8[%c0_36, %c5, %c0_37], %109 {strides = array<i32>} : memref<1x8x128xf32, #tpu.memory_space<vmem>>, vector<1x3x128xf32>,
    return
  }
  func.func @transform_0(%arg0: i32, %arg1: i32) -> (i32, i32, i32) {
    %c0_i32 = arith.constant 0 : i32
    %c0_i32_0 = arith.constant 0 : i32
    return %arg0, %c0_i32, %arg1 : i32, i32, i32
  }
  func.func @transform_1(%arg0: i32, %arg1: i32) -> (i32, i32, i32) {
    %c0_i32 = arith.constant 0 : i32
    %c0_i32_0 = arith.constant 0 : i32
    return %arg0, %c0_i32, %arg1 : i32, i32, i32
  }
  func.func @transform_2(%arg0: i32, %arg1: i32) -> (i32, i32, i32) {
    %c0_i32 = arith.constant 0 : i32
    %c0_i32_0 = arith.constant 0 : i32
    %c0_i32_1 = arith.constant 0 : i32
    return %arg0, %c0_i32, %c0_i32_0 : i32, i32, i32
  }
  func.func @transform_3(%arg0: i32, %arg1: i32) -> (i32, i32) {
    %c0_i32 = arith.constant 0 : i32
    %c0_i32_0 = arith.constant 0 : i32
    %c0_i32_1 = arith.constant 0 : i32
    return %c0_i32, %c0_i32_0 : i32, i32
  }
  func.func @transform_4(%arg0: i32, %arg1: i32) -> (i32, i32) {
    %c0_i32 = arith.constant 0 : i32
    %c0_i32_0 = arith.constant 0 : i32
    %c0_i32_1 = arith.constant 0 : i32
    return %c0_i32, %c0_i32_0 : i32, i32
  }
  func.func @transform_5(%arg0: i32, %arg1: i32) -> (i32, i32) {
    %c0_i32 = arith.constant 0 : i32
    %c0_i32_0 = arith.constant 0 : i32
    %c0_i32_1 = arith.constant 0 : i32
    return %c0_i32, %c0_i32_0 : i32, i32
  }
  func.func @transform_6(%arg0: i32, %arg1: i32) -> (i32, i32, i32) {
    %c0_i32 = arith.constant 0 : i32
    %c0_i32_0 = arith.constant 0 : i32
    return %arg0, %c0_i32, %arg1 : i32, i32, i32
  }
}

</mosaic_0001>

<bundles_post_ra>
// kernel: tpu_custom_call.1
= control target key start
LH: loop header
LB: loop body
LE: loop exit
PB: predicated region body
PF: predicated region fallthrough
CT: control target
= control target key end

     0   :  { %11 = vsyncpa [#allocation3], 0  ;;  %s1748_s0 = inlined_call_operand.vmem [shape: f32[2,3,128], index: 0, kind: input, shape index: {}]   ;;  %s1749_s1 = inlined_call_operand.vmem [shape: f32[2,8,128], index: 1, kind: input, shape index: {}]   ;;  %s1750_s2 = inlined_call_operand.vmem [shape: f32[2,32,1], index: 2, kind: input, shape index: {}]   ;;  %s1751_s3 = inlined_call_operand.vmem [shape: f32[32,3], index: 3, kind: input, shape index: {}]   ;;  %s1752_s4 = inlined_call_operand.vmem [shape: f32[32,256], index: 4, kind: input, shape index: {}]   ;;  %s1753_s5 = inlined_call_operand.vmem [shape: f32[32,1], index: 5, kind: input, shape index: {}]   ;;  %s1754_s6 = inlined_call_operand.hbm [shape: f32[2,8,128], index: 6, kind: output, shape index: {}]  }
   0x1   :  { %13 = vsyncpa [#allocation3 + $0x1], 0  ;;  %s1432_s21 = smov 0   ;;  %s1434_s22 = smov 0  }
   0x2   :  { %s1436_s23 = smov 0   ;;  %s1438_s24 = smov 0  }
   0x3   :  { %s1440_s25 = smov 0   ;;  %s1442_s26 = smov 0  }
   0x4 LB: > { %s1093_s27 = sadd.s32 4294967295, %s1388_s26   ;;  %s1094_s28 = sadd.s32 4294967294, %s1388_s26   ;;  %s1388_s26 = sphi %s1442_s26, %s19_s26   ;;  %s1384_s25 = sphi %s1440_s25, %s1761_s25   ;;  %s1380_s24 = sphi %s1438_s24, %s1760_s24   ;;  %s1376_s23 = sphi %s1436_s23, %s1759_s23   ;;  %s1372_s22 = sphi %s1434_s22, %s1758_s22   ;;  %s1368_s21 = sphi %s1432_s21, %s1757_s21  }
   0x5   : > { %s31_s29 = sadd.s32 1, %s1384_s25  ;;  %s185_s30 = sadd.s32 1, %s1376_s23 }
   0x6   : > { %p33_p0 = scmp.ge.s32.totalorder %s31_s29, 2  ;;  %p195_p1 = scmp.ne.s32.totalorder %s1376_s23, %s1372_s22 }
   0x7   : > { %p196_p2 = scmp.eq.s32.totalorder %s1093_s27, 1  ;;  %p201_p3 = scmp.ne.s32.totalorder %s1372_s22, %s1368_s21 }
   0x8   : > { %s1763_s29 = smov (%p33_p0, %s31_s29), 0  ;;  %p202_p5 = scmp.eq.s32.totalorder %s1094_s28, 1 }
   0x9   : > { %p1472_p4 = por %p196_p2, %p195_p1  ;;  %s180_s8 = ssub.s32 %s1384_s25, %s1763_s29 }
   0xa   : > { %p1097_p6 = scmp.ge.s32.totalorder %s1388_s26, 1  ;;  %p183_p7 = scmp.eq.s32.totalorder %s180_s8, 0 }
   0xb   : > { %p1479_p8 = por %p202_p5, %p201_p3  ;;  %p257_p9 = scmp.lt.s32.totalorder %s1388_s26, 3 }
   0xc   : > { %s1485_s10 = scalar_select %p183_p7, %s1376_s23, %s185_s30  }
   0xd   : > { %p258_p10 = pnand %p1097_p6, %p257_p9 }
   0xe   : > { %v326_v0 = vld [vmem:[%s1751_s3] sm:$0xff] (!%p258_p10)  ;;  %v1390_v1 = vmov (!%p258_p10), 2   ;;  %v1391_v2 = vmov (!%p258_p10), 1   ;;  %v328_v3 = vld [vmem:[%s1751_s3 + $0x10] sm:$0xff] (!%p258_p10)  ;;  %v327_v4 = vld [vmem:[%s1751_s3 + $0x8] sm:$0xff] (!%p258_p10)  ;;  %p301_p11 = scmp.lt.s32.totalorder (!%p258_p10), %s1380_s24, 1  ;;  %v362_v19 = vlaneseq (!%p258_p10) }
   0xf   : > { %261 = sbr.rel (%p258_p10) target bundleno = 728 (0x2d8), region = 44  ;;  %1284 = vset.pattern.permute.xlu0 (!%p258_p10), %v1390_v1  ;;  %1283 = vset.pattern.permute.xlu1 (!%p258_p10), %v1391_v2  ;;  %v1392_v5 = vmov (!%p258_p10), 0   ;;  %v329_v6 = vld [vmem:[%s1751_s3 + $0x18] sm:$0xff] (!%p258_p10)  ;;  %v338_v8 = vld [vmem:[%s1753_s5] sm:$0xff] (!%p258_p10)  ;;  %v340_v9 = vld [vmem:[%s1753_s5 + $0x10] sm:$0xff] (!%p258_p10)  ;;  %vm770_vm4 = vcmask (!%p258_p10), 64512  }
  0x10   : > { %399 = vperm.xlu0 (!%p258_p10), %1284, %v326_v0   ;;  %371 = vperm.xlu1 (!%p258_p10), %1283, %v326_v0   ;;  %v339_v13 = vld [vmem:[%s1753_s5 + $0x8] sm:$0xff] (!%p258_p10)  ;;  %v341_v14 = vld [vmem:[%s1753_s5 + $0x18] sm:$0xff] (!%p258_p10)  ;;  %v1527_v22 = vshrl.u32 (!%p258_p10), %v362_v19, 7  ;;  %v1393_v26 = vmov (!%p258_p10), 1966171168   ;;  %vm1395_vm5 = vmmov (!%p258_p10), 0  }
  0x11   : > { %v331_v15 = vld [vmem:[%s1752_s4 + $0x8] sm:$0xff] (!%p258_p10)  ;;  %v337_v16 = vld [vmem:[%s1752_s4 + $0x38] sm:$0xff] (!%p258_p10)  ;;  %v429_v27 = vunpack.c.l.s4 (!%p258_p10), %v1393_v26  ;;  %s298_s15 = sand.u32 (!%p258_p10), 1, %s1372_s22   ;;  %vm971_vm8 = vcmask (!%p258_p10), 1041409   ;;  %vm973_vm9 = vcmask (!%p258_p10), 1042434  }
  0x12   : > { %716 = vmatprep.mubr.f32.mxu0 (!%p258_p10), %v331_v15  ;;  %731 = vmatprep.mubr.f32.mxu1 (!%p258_p10), %v337_v16  ;;  %v1534_v23 = vsub.s32 (!%p258_p10), 0, %v1527_v22  ;;  %v388_v28 = vsub.s32 (!%p258_p10), 1, %v1527_v22  ;;  %v416_v30 = vsub.s32 (!%p258_p10), 2, %v1527_v22  ;;  %vm765_vm1 = vcmp.lt.s32.totalorder (!%p258_p10), %v1527_v22, 7 }
  0x13   : > { %v430_v33 = vunpack.c.0.s8 (!%p258_p10), %v429_v27  ;;  %vm844_vm6 = vcmp.eq.s32.totalorder (!%p258_p10), %v1527_v22, 7 }
  0x14   : > { %407 = vperm.xlu0 (!%p258_p10), %1284, %v328_v3   ;;  %375 = vperm.xlu1 (!%p258_p10), %1283, %v327_v4  }
  0x15   : > { %v433_v41 = vsub.s32 (!%p258_p10), %v430_v33, %v1527_v22 }
  0x16   : > { %s1498_s17 = scalar_select %p301_p11, %s1380_s24, 1 }
  0x18   : > { %1288 = vset.pattern.permute.xlu0 %v1392_v5  ;;  %1285 = vset.pattern.permute.xlu1 %v1390_v1  ;;  %s1115_s18 = sshll.u32 %s1498_s17, 5  ;;  %s1100_s8 = sshll.u32 %s1498_s17, 3 }
  0x19   : > { %344 = vperm.xlu0 %1288, %v326_v0   ;;  %403 = vperm.xlu1 %1285, %v327_v4   ;;  %s319_s30 = scalar_lea.vmem %s1750_s2, %s1115_s18  ;;  %s314_s16 = scalar_lea.vmem %s1749_s1, %s1100_s8 }
  0x1a   : > { %v323_v7 = vld [vmem:[%s319_s30 + $0x8] sm:$0xff]  ;;  %v322_v10 = vld [vmem:[%s319_s30] sm:$0xff]  ;;  %v324_v11 = vld [vmem:[%s319_s30 + $0x10] sm:$0xff]  ;;  %s1112_s18 = sshll.u32 %s1380_s24, 7  ;;  %s981_s24 = scalar_lea.sflag [#allocation3], %s298_s15 }
  0x1b   : > { %v325_v12 = vld [vmem:[%s319_s30 + $0x18] sm:$0xff]  ;;  %s1099_s30 = sshll.u32 %s1498_s17, 2  ;;  %v1542_v34 = vld [vmem:[%s314_s16] sm:$0xff]  ;;  %s1098_s16 = sshll.u32 %s298_s15, 3 }
  0x1c   : > { %s307_s13 = scalar_lea.vmem %s1748_s0, %s1099_s30  ;;  %v427_v38 = vcombine.high %v1542_v34, %v1542_v34  ;;  %v434_v49 = vrot.slane %v1542_v34, %v433_v41  ;;  %s1687_s17 = scalar_lea.vmem [#allocation2], %s1098_s16 }
  0x1d   : > { %349 = vperm.xlu0 %1288, %v327_v4   ;;  %1286 = vset.pattern.permute.xlu1 %v1392_v5  ;;  %v320_v29 = vld [vmem:[%s307_s13] sm:$0x7]  ;;  %s995_s19 = sshll.u32 %s1687_s17, 4  ;;  %s1698_s28 = scalar_lea.hbm %s1754_s6, %s1112_s18  ;;  %s1700_s19 = int_to_ptr.vmem [resolvable:$true] %s995_s19 }
  0x1e   : > { %354 = vperm.xlu1 %1286, %v328_v3   ;;  %v365_v31 = vrot.slane %v320_v29, %v1534_v23  ;;  %v389_v36 = vrot.slane %v320_v29, %v388_v28  ;;  %v417_v39 = vrot.slane %v320_v29, %v416_v30  ;;  %v441_v46 = vrot.slane %v427_v38, %v433_v41  ;;  %s1310_s30 = scalar_lea.vmem %s1700_s19, 128  ;;  %s1396_s8 = smov [#allocation2]  }
  0x1f   : > { %v450_v55 = vrot.slane %v434_v49, %v433_v41  ;;  %p1311_p12 = scmp.ne.s32.totalorder %s1700_s19, %s1310_s30  ;;  %s1314_s11 = sshll.u32 %s1396_s8, 4  ;;  %s1315_s11 = int_to_ptr.vmem [resolvable:$false] %s1314_s11 }
  0x20   : > { %v457_v52 = vrot.slane %v441_v46, %v433_v41  ;;  %v443_v60 = vcombine.high %v441_v46, %v441_v46  ;;  %s1316_s12 = scalar_lea.vmem %s1315_s11, 256  ;;  %p1317_p1 = scmp.lt.s32.totalorder %s1700_s19, %s1315_s11 }
  0x21   : > { %359 = vperm.xlu0 %1288, %v329_v6   ;;  %v479_v58 = vrot.slane %v450_v55, %v1534_v23  ;;  %p1312_p13 = pnand %p1311_p12, %p1472_p4  ;;  %p1318_p2 = scmp.lt.s32.totalorder %s1316_s12, %s1310_s30 }
  0x22   : > { %1287 = vset.pattern.permute.xlu1 %v1391_v2  ;;  %v495_v57 = vrot.slane %v457_v52, %v1534_v23 }
  0x23   : > { %379 = vperm.xlu1 %1287, %v328_v3   ;;  %p1313_p0 = pneg %p1312_p13  ;;  %p1319_p3 = por %p1318_p2, %p1317_p1 }
  0x25   : > { %555 = vperm.xlu0 %1288, %v323_v7   ;;  %v442_v7 = vcombine.high %v434_v49, %v434_v49  ;;  %p1320_p5 = pnand %p1319_p3, %p1313_p0 }
  0x27   : > { %383 = vperm.xlu1 %1287, %v329_v6  }
  0x29   : > { %634 = vperm.xlu0 %1288, %v338_v8   ;;  %v1559_v8 = vrot.slane %v443_v60, %v433_v41 }
  0x2b   : > { %1289 = vset.pattern.permute.xlu1 %v1390_v1  ;;  %v499_v15 = vrot.slane %v1559_v8, %v1534_v23  ;;  %v475_v49 = vcombine.high %v1559_v8, %v1559_v8 }
  0x2c   : > { %411 = vperm.xlu1 %1289, %v329_v6  }
  0x2d   : > { %644 = vperm.xlu0 %1288, %v340_v9  }
  0x30   : > { %1290 = vset.pattern.permute.xlu1 %v1392_v5 }
  0x31   : > { %550 = vperm.xlu1 %1290, %v322_v10  }
  0x35   : > { %560 = vperm.xlu1 %1290, %v324_v11  }
  0x39   : > { %565 = vperm.xlu1 %1290, %v325_v12  }
  0x3d   : > { %639 = vperm.xlu1 %1290, %v339_v13  }
  0x41   : > { %649 = vperm.xlu1 %1290, %v341_v14  }
  0x8f   : > { %v372_v17 = vpop.permute.xlu1 %371  ;;  %v400_v18 = vpop.permute.xlu0 %399 }
  0x90   : > { %v390_v47 = vmul.f32 %v389_v36, %v372_v17  ;;  %v418_v53 = vmul.f32 %v417_v39, %v400_v18 }
  0x93   : > { %v376_v20 = vpop.permute.xlu1 %375  ;;  %v408_v21 = vpop.permute.xlu0 %407 }
  0x94   : > { %v391_v40 = vmul.f32 %v389_v36, %v376_v20  ;;  %v420_v5 = vmul.f32 %v417_v39, %v408_v21  ;;  %v473_v20 = vcombine.high %v457_v52, %v457_v52 }
  0x98   : > { %v345_v24 = vpop.permute.xlu0 %344  ;;  %v404_v25 = vpop.permute.xlu1 %403 }
  0x99   : > { %v366_v44 = vmul.f32 %v365_v31, %v345_v24  ;;  %v419_v45 = vmul.f32 %v417_v39, %v404_v25  ;;  %v472_v24 = vcombine.high %v450_v55, %v450_v55  ;;  %v1572_v25 = vrot.slane %v442_v7, %v433_v41 }
  0x9a   : > { %v503_v41 = vrot.slane %v473_v20, %v1534_v23 }
  0x9b   : > { %v394_v54 = vadd.f32 %v390_v47, %v366_v44  ;;  %v483_v33 = vrot.slane %v1572_v25, %v1534_v23 }
  0x9c   : > { %v350_v32 = vpop.permute.xlu0 %349 }
  0x9d   : > { %v355_v35 = vpop.permute.xlu1 %354  ;;  %v367_v37 = vmul.f32 %v365_v31, %v350_v32  ;;  %v1553_v62 = vadd.f32 %v418_v53, %v394_v54 }
  0x9e   : > { %v368_v59 = vmul.f32 %v365_v31, %v355_v35 }
  0x9f   : > { %v395_v42 = vadd.f32 %v391_v40, %v367_v37  ;;  %v532_v10 = vmul.f32 %v495_v57, %v1553_v62  ;;  %v516_v11 = vmul.f32 %v479_v58, %v1553_v62  ;;  %v536_v32 = vmul.f32 %v499_v15, %v1553_v62 }
  0xa0   : > { %v360_v48 = vpop.permute.xlu0 %359  ;;  %v520_v47 = vmul.f32 %v483_v33, %v1553_v62 }
  0xa1   : > { %v1548_v50 = vadd.f32 %v419_v45, %v395_v42  ;;  %v369_v3 = vmul.f32 %v365_v31, %v360_v48  ;;  %v1588_v42 = vrot.slane %v472_v24, %v1534_v23 }
  0xa2   : > { %v380_v43 = vpop.permute.xlu1 %379 }
  0xa3   : > { %v392_v56 = vmul.f32 %v389_v36, %v380_v43  ;;  %v533_v61 = vmul.f32 %v495_v57, %v1548_v50  ;;  %v517_v1 = vmul.f32 %v479_v58, %v1548_v50  ;;  %v537_v38 = vmul.f32 %v499_v15, %v1548_v50 }
  0xa4   : > { %v1555_v63 = vpop.permute.xlu0 %555  ;;  %v521_v48 = vmul.f32 %v483_v33, %v1548_v50  ;;  %v525_v24 = vmul.f32 %v1588_v42, %v1548_v50 }
  0xa5   : > { %v396_v2 = vadd.f32 %v392_v56, %v368_v59  ;;  %v585_v6 = vadd.f32 %v1555_v63, %v533_v61  ;;  %v569_v12 = vadd.f32 %v1555_v63, %v517_v1  ;;  %v589_v53 = vadd.f32 %v1555_v63, %v537_v38 }
  0xa6   : > { %v384_v51 = vpop.permute.xlu1 %383  ;;  %v573_v1 = vadd.f32 %v1555_v63, %v521_v48 }
  0xa7   : > { %v393_v4 = vmul.f32 %v389_v36, %v384_v51  ;;  %v1564_v13 = vadd.f32 %v420_v5, %v396_v2  ;;  %v617_v21 = vmax.f32 %v585_v6, 0.0  ;;  %v601_v29 = vmax.f32 %v569_v12, 0.0 }
  0xa8   : > { %v621_v7 = vmax.f32 %v589_v53, 0.0 }
  0xa9   : > { %v397_v16 = vadd.f32 %v393_v4, %v369_v3  ;;  %v534_v31 = vmul.f32 %v495_v57, %v1564_v13  ;;  %v518_v37 = vmul.f32 %v479_v58, %v1564_v13  ;;  %v540_v3 = vmul.f32 %v503_v41, %v1553_v62 }
  0xaa   : > { %v541_v4 = vmul.f32 %v503_v41, %v1548_v50 }
  0xab   : > { %v412_v0 = vpop.permute.xlu1 %411 }
  0xac   : > { %v421_v9 = vmul.f32 %v417_v39, %v412_v0 }
  0xae   : > { %v1574_v26 = vadd.f32 %v421_v9, %v397_v16 }
  0xb0   : > { %v1566_v14 = vpop.permute.xlu1 %550  ;;  %v535_v43 = vmul.f32 %v495_v57, %v1574_v26  ;;  %v519_v44 = vmul.f32 %v479_v58, %v1574_v26  ;;  %v539_v54 = vmul.f32 %v499_v15, %v1574_v26  ;;  %v538_v58 = vmul.f32 %v499_v15, %v1564_v13 }
  0xb1   : > { %v584_v17 = vadd.f32 %v1566_v14, %v532_v10  ;;  %v568_v18 = vadd.f32 %v1566_v14, %v516_v11  ;;  %v588_v40 = vadd.f32 %v1566_v14, %v536_v32  ;;  %v572_v57 = vadd.f32 %v1566_v14, %v520_v47 }
  0xb2   : > { %v523_v2 = vmul.f32 %v483_v33, %v1574_v26  ;;  %v522_v10 = vmul.f32 %v483_v33, %v1564_v13  ;;  %v592_v16 = vadd.f32 %v1566_v14, %v540_v3 }
  0xb3   : > { %v616_v27 = vmax.f32 %v584_v17, 0.0  ;;  %v600_v28 = vmax.f32 %v568_v18, 0.0  ;;  %v620_v56 = vmax.f32 %v588_v40, 0.0  ;;  %v604_v9 = vmax.f32 %v572_v57, 0.0 }
  0xb4   : > { %v1576_v30 = vpop.permute.xlu1 %560  ;;  %v474_v17 = vcombine.high %v1572_v25, %v1572_v25  ;;  %v605_v18 = vmax.f32 %v573_v1, 0.0  ;;  %v507_v25 = vrot.slane %v475_v49, %v1534_v23  ;;  %v577_v40 = vadd.f32 %v1555_v63, %v525_v24  ;;  %v330_v24 = vld [vmem:[%s1752_s4] sm:$0xff] }
  0xb5   : > { %v1174_v35 = vpack.c.bf16 %v617_v21, %v616_v27  ;;  %v1176_v36 = vpack.c.bf16 %v601_v29, %v600_v28  ;;  %v586_v39 = vadd.f32 %v1576_v30, %v534_v31  ;;  %v570_v45 = vadd.f32 %v1576_v30, %v518_v37 }
  0xb6   : > { %v590_v8 = vadd.f32 %v1576_v30, %v538_v58  ;;  %v1182_v12 = vpack.c.bf16 %v621_v7, %v620_v56  ;;  %v574_v20 = vadd.f32 %v1576_v30, %v522_v10  ;;  %v524_v21 = vmul.f32 %v1588_v42, %v1553_v62 }
  0xb7   : > { %1175 = vmatprep.subr.bf16.mxu0 %v1174_v35  ;;  %1206 = vmatprep.subr.bf16.mxu1 %v1174_v35  ;;  %v618_v55 = vmax.f32 %v586_v39, 0.0  ;;  %v602_v60 = vmax.f32 %v570_v45, 0.0  ;;  %v593_v28 = vadd.f32 %v1555_v63, %v541_v4  ;;  %v543_v29 = vmul.f32 %v503_v41, %v1574_v26 }
  0xb8   : > { %v1593_v46 = vpop.permute.xlu1 %565  ;;  %1177 = vmatpush3.bf16.msra.mxu0 %v1176_v36  ;;  %1214 = vmatpush3.bf16.msra.mxu1 %v1176_v36  ;;  %v622_v27 = vmax.f32 %v590_v8, 0.0  ;;  %v1184_v31 = vpack.c.bf16 %v605_v18, %v604_v9  ;;  %v576_v33 = vadd.f32 %v1566_v14, %v524_v21  ;;  %v624_v36 = vmax.f32 %v592_v16, 0.0 }
  0xb9   : > { %v587_v51 = vadd.f32 %v1593_v46, %v535_v43  ;;  %v571_v52 = vadd.f32 %v1593_v46, %v519_v44  ;;  %v591_v0 = vadd.f32 %v1593_v46, %v539_v54  ;;  %v575_v11 = vadd.f32 %v1593_v46, %v523_v2 }
  0xba   : > { %v542_v37 = vmul.f32 %v503_v41, %v1564_v13  ;;  %v595_v38 = vadd.f32 %v1593_v46, %v543_v29  ;;  %v606_v39 = vmax.f32 %v574_v20, 0.0  ;;  %v527_v43 = vmul.f32 %v1588_v42, %v1574_v26 }
  0xbb   : > { %v619_v59 = vmax.f32 %v587_v51, 0.0  ;;  %v603_v61 = vmax.f32 %v571_v52, 0.0  ;;  %v623_v15 = vmax.f32 %v591_v0, 0.0  ;;  %v607_v32 = vmax.f32 %v575_v11, 0.0 }
  0xbc   : > { %v491_v44 = vrot.slane %v474_v17, %v1534_v23  ;;  %v625_v45 = vmax.f32 %v593_v28, 0.0  ;;  %v594_v47 = vadd.f32 %v1576_v30, %v542_v37  ;;  %v544_v48 = vmul.f32 %v507_v25, %v1553_v62 }
  0xbd   : > { %v1178_v5 = vpack.c.bf16 %v619_v59, %v618_v55  ;;  %v1180_v6 = vpack.c.bf16 %v603_v61, %v602_v60  ;;  %v1186_v35 = vpack.c.bf16 %v623_v15, %v622_v27  ;;  %v545_v41 = vmul.f32 %v507_v25, %v1548_v50  ;;  %v336_v27 = vld [vmem:[%s1752_s4 + $0x30] sm:$0xff] }
  0xbe   : > { %v1188_v49 = vpack.c.bf16 %v607_v32, %v606_v39  ;;  %v608_v51 = vmax.f32 %v576_v33, 0.0  ;;  %v526_v52 = vmul.f32 %v1588_v42, %v1564_v13  ;;  %v579_v53 = vadd.f32 %v1593_v46, %v527_v43  ;;  %v332_v33 = vld [vmem:[%s1752_s4 + $0x10] sm:$0xff] }
  0xbf   : > { %1179 = vmatprep.subr.bf16.mxu0 %v1178_v5  ;;  %1207 = vmatprep.subr.bf16.mxu1 %v1178_v5  ;;  %v1190_v54 = vpack.c.bf16 %v625_v45, %v624_v36  ;;  %v627_v55 = vmax.f32 %v595_v38, 0.0  ;;  %v596_v23 = vadd.f32 %v1566_v14, %v544_v48  ;;  %v609_v56 = vmax.f32 %v577_v40, 0.0  ;;  %v334_v36 = vld [vmem:[%s1752_s4 + $0x20] sm:$0xff]  ;;  %v635_v45 = vpop.permute.xlu0 %634 }
  0xc0   : > { %1181 = vmatpush3.bf16.msra.mxu0 %v1180_v6  ;;  %1215 = vmatpush3.bf16.msra.mxu1 %v1180_v6  ;;  %v578_v57 = vadd.f32 %v1576_v30, %v526_v52  ;;  %v528_v58 = vmul.f32 %v491_v44, %v1553_v62  ;;  %v529_v59 = vmul.f32 %v491_v44, %v1548_v50  ;;  %v626_v60 = vmax.f32 %v594_v47, 0.0 }
  0xc1   : > { %1183 = vmatprep.subr.bf16.mxu0 %v1182_v12  ;;  %1208 = vmatprep.subr.bf16.mxu1 %v1182_v12  ;;  %v597_v42 = vadd.f32 %v1555_v63, %v545_v41  ;;  %v547_v61 = vmul.f32 %v507_v25, %v1574_v26  ;;  %v1192_v0 = vpack.c.bf16 %v609_v56, %v608_v51  ;;  %v611_v1 = vmax.f32 %v579_v53, 0.0 }
  0xc2   : > { %v580_v2 = vadd.f32 %v1566_v14, %v528_v58  ;;  %v1194_v3 = vpack.c.bf16 %v627_v55, %v626_v60  ;;  %v628_v4 = vmax.f32 %v596_v23, 0.0  ;;  %v546_v5 = vmul.f32 %v507_v25, %v1564_v13 }
  0xc3   : > { %v599_v6 = vadd.f32 %v1593_v46, %v547_v61  ;;  %v610_v50 = vmax.f32 %v578_v57, 0.0  ;;  %v581_v62 = vadd.f32 %v1555_v63, %v529_v59  ;;  %v531_v7 = vmul.f32 %v491_v44, %v1574_v26 }
  0xc4   : > { %1185 = vmatpush3.bf16.msra.mxu0 %v1184_v31  ;;  %1216 = vmatpush3.bf16.msra.mxu1 %v1184_v31  ;;  %v629_v8 = vmax.f32 %v597_v42, 0.0  ;;  %v598_v9 = vadd.f32 %v1576_v30, %v546_v5  ;;  %v1650_v14 = vand.u32 127, %v362_v19  ;;  %v612_v11 = vmax.f32 %v580_v2, 0.0  ;;  %v333_v31 = vld [vmem:[%s1752_s4 + $0x18] sm:$0xff] }
  0xc5   : > { %1187 = vmatprep.subr.bf16.mxu0 %v1186_v35  ;;  %1209 = vmatprep.subr.bf16.mxu1 %v1186_v35  ;;  %v1196_v10 = vpack.c.bf16 %v611_v1, %v610_v50  ;;  %v530_v12 = vmul.f32 %v491_v44, %v1564_v13  ;;  %v583_v15 = vadd.f32 %v1593_v46, %v531_v7  ;;  %v631_v17 = vmax.f32 %v599_v6, 0.0  ;;  %v335_v35 = vld [vmem:[%s1752_s4 + $0x28] sm:$0xff]  ;;  %v645_v6 = vpop.permute.xlu0 %644 }
  0xc6   : > { %v1198_v16 = vpack.c.bf16 %v629_v8, %v628_v4  ;;  %v613_v63 = vmax.f32 %v581_v62, 0.0  ;;  %v630_v18 = vmax.f32 %v598_v9, 0.0  ;;  %v760_v20 = vadd.s32 1, %v1527_v22 }
  0xc7   : > { %v582_v26 = vadd.f32 %v1576_v30, %v530_v12  ;;  %v615_v21 = vmax.f32 %v583_v15, 0.0  ;;  %vm764_vm0 = vcmp.eq.s32.totalorder %v1650_v14, %v1527_v22  ;;  %v1394_v28 = vmov 0.0  }
  0xc8   : > { %1189 = vmatpush3.bf16.msra.mxu0 %v1188_v49  ;;  %1217 = vmatpush3.bf16.msra.mxu1 %v1188_v49  ;;  %v1200_v19 = vpack.c.bf16 %v613_v63, %v612_v11  ;;  %v1202_v13 = vpack.c.bf16 %v631_v17, %v630_v18  ;;  %vm761_vm2 = vcmp.eq.s32.totalorder %v1650_v14, %v760_v20  ;;  %vm766_vm3 = vmand %vm764_vm0, %vm765_vm1 }
  0xc9   : > { %1191 = vmatprep.subr.bf16.mxu0 %v1190_v54  ;;  %1210 = vmatprep.subr.bf16.mxu1 %v1190_v54  ;;  %v614_v46 = vmax.f32 %v582_v26, 0.0  ;;  %v1106_v29 = vsel %vm761_vm2, 1.0, %v1394_v28  ;;  %v1107_v25 = vsel %vm766_vm3, 1.0, %v1394_v28  ;;  %vm853_vm7 = vcmp.lt.s32.totalorder %v1650_v14, %v1527_v22  ;;  %979 = vst [vmem:[%s1687_s17 + $0x5] sm:$0x7] %v1394_v28 }
  0xca   : > { %v769_v32 = vsub.f32 %v1106_v29, %v1107_v25  ;;  %v1109_v2 = vsel %vm853_vm7, 1.0, %v1394_v28 }
  0xcb   : > { %v1204_v30 = vpack.c.bf16 %v615_v21, %v614_v46 }
  0xcc   : > { %1193 = vmatpush3.bf16.msra.mxu0 %v1192_v0  ;;  %1218 = vmatpush3.bf16.msra.mxu1 %v1192_v0 }
  0xcd   : > { %1195 = vmatprep.subr.bf16.mxu0 %v1194_v3  ;;  %1211 = vmatprep.subr.bf16.mxu1 %v1194_v3  ;;  %v640_v3 = vpop.permute.xlu1 %639 }
  0xd0   : > { %1197 = vmatpush3.bf16.msra.mxu0 %v1196_v10  ;;  %1219 = vmatpush3.bf16.msra.mxu1 %v1196_v10 }
  0xd1   : > { %1199 = vmatprep.subr.bf16.mxu0 %v1198_v16  ;;  %1212 = vmatprep.subr.bf16.mxu1 %v1198_v16  ;;  %v650_v4 = vpop.permute.xlu1 %649 }
  0xd4   : > { %1201 = vmatpush3.bf16.msra.mxu0 %v1200_v19  ;;  %1220 = vmatpush3.bf16.msra.mxu1 %v1200_v19 }
  0xd5   : > { %1203 = vmatprep.subr.bf16.mxu0 %v1202_v13  ;;  %1213 = vmatprep.subr.bf16.mxu1 %v1202_v13 }
  0xd8   : > { %1205 = vmatpush3.bf16.msra.mxu0 %v1204_v30  ;;  %1221 = vmatpush3.bf16.msra.mxu1 %v1204_v30 }
  0xd9   : > { %1164 = vmatprep.subr.mxu1 %v1394_v28 }
  0xdb   : > { %717 = vmatmul.mubr.f32.vlgmr.msra.gmra.mrb[0].mxu0 %v330_v24  ;;  %732 = vmatmul.mubr.f32.vlgmr.msra.gmra.mrb[0].mxu1 %v336_v27 }
  0xdc   : > { %721 = vmatprep.mubr.f32.mxu0 %v333_v31  ;;  %1165 = vmatpush3.msra.mxu1 %v1542_v34 }
  0xdd   : > { %1166 = vmatprep.mubr.msk.f32.mxu1 %vm1395_vm5, %v1394_v28  ;;  %1169 = vmatprep.subr.mxu1 %v1394_v28 }
  0xdf   : > { %722 = vmatmul.mubr.f32.gmra.mrb[2].mxu0 %v332_v33  ;;  %1167 = vmatmul.mubr.msk.f32.vlgmr.msra.gmra.mrb[2].mxu1 %vm770_vm4, %v769_v32 }
  0xe0   : > { %726 = vmatprep.mubr.f32.mxu0 %v335_v35  ;;  %1171 = vmatprep.mubr.msk.f32.mxu1 %vm1395_vm5, %v1394_v28 }
  0xe3   : > { %727 = vmatmul.mubr.f32.gmra.mrb[4].mxu0 %v334_v36 }
 0x1ae   : > { %v1148_v37 = vpop.f32.mrb[0].mxu0  ;;  %v1157_v38 = vpop.f32.mrb[0].mxu1 }
 0x1af   : > { %v1149_v39 = vpop.f32.mrb[1].mxu0  ;;  %v1158_v40 = vpop.f32.mrb[1].mxu1 }
 0x1b0   : > { %v1150_v43 = vadd.f32 %v1149_v39, %v1148_v37  ;;  %v1159_v44 = vadd.f32 %v1158_v40, %v1157_v38 }
 0x1b2   : > { %v719_v47 = vadd.f32 %v1150_v43, %v635_v45  ;;  %v1151_v48 = vpop.f32.mrb[2].mxu0  ;;  %v840_v41 = vpop.f32.mrb[2].mxu1  ;;  %v734_v5 = vadd.f32 %v1159_v44, %v650_v4 }
 0x1b3   : > { %v1152_v49 = vpop.f32.mrb[3].mxu0  ;;  %v845_v51 = vmax.f32 %v840_v41, 0.0  ;;  %v1168_v52 = vpop.f32.mrb[3].mxu1 }
 0x1b4   : > { %v737_v53 = vmax.f32 %v719_v47, 0.0  ;;  %v1153_v54 = vadd.f32 %v1152_v49, %v1151_v48  ;;  %v1105_v22 = vmul.f32 -1.442695, %v734_v5 }
 0x1b5   : > { %v846_v55 = vsel %vm844_vm6, 1e+10, %v845_v51 }
 0x1b6   : > { %v847_v23 = vsub.f32 0.0, %v737_v53  ;;  %v1154_v56 = vpop.f32.mrb[4].mxu0  ;;  %v724_v50 = vadd.f32 %v1153_v54, %v640_v3 }
 0x1b7   : > { %v1155_v57 = vpop.f32.mrb[5].mxu0 }
 0x1b8   : > { %v848_v58 = vmul.f32 %v847_v23, %v846_v55  ;;  %v1156_v59 = vadd.f32 %v1155_v57, %v1154_v56  ;;  %v1103_v7 = vmul.f32 -1.442695, %v724_v50 }
 0x1ba   : > { %v849_v60 = vmul.f32 1.442695, %v848_v58  ;;  %v729_v62 = vadd.f32 %v1156_v59, %v645_v6 }
 0x1bc   : > { %1292 = vpow2.f32 %v849_v60  ;;  %v1104_v8 = vmul.f32 -1.442695, %v729_v62 }
 0x1c6   : > { %v1293_v42 = vpop.eup %1292 }
 0x1c7   : > { %v852_v61 = vadd.f32 1e-10, %v1293_v42  ;;  %v851_v18 = vsub.f32 1.0, %v1293_v42 }
 0x1c9   : > { %1294 = vlog2.f32 %v852_v61 }
 0x1ca   : > { %1296 = vpow2.f32 %v1105_v22 }
 0x1cb   : > { %1298 = vpow2.f32 %v1103_v7 }
 0x1cc   : > { %1300 = vpow2.f32 %v1104_v8 }
 0x1d3   : > { %v1295_v0 = vpop.eup %1294 }
 0x1d4   : > { %v857_v1 = vmul.f32 0.6931472, %v1295_v0  ;;  %v1297_v9 = vpop.eup %1296 }
 0x1d5   : > { %v1299_v14 = vpop.eup %1298  ;;  %v749_v11 = vadd.f32 1.0, %v1297_v9 }
 0x1d6   : > { %1170 = vmatpush3.msra.mxu1 %v857_v1  ;;  %v1301_v10 = vpop.eup %1300  ;;  %v747_v12 = vadd.f32 1.0, %v1299_v14 }
 0x1d7   : > { %1172 = vmatmul.mubr.msk.f32.vlgmr.msra.gmra.mrb[4].mxu1 %vm770_vm4, %v1109_v2  ;;  %v748_v16 = vadd.f32 1.0, %v1301_v10  ;;  %1302 = vrcp.f32 %v749_v11 }
 0x1e1   : > { %v1303_v26 = vpop.eup %1302 }
 0x2aa   : > { %v927_v15 = vpop.f32.mrb[4].mxu1 }
 0x2ab   : > { %v931_v17 = vmul.f32 1.442695, %v927_v15  ;;  %v1173_v63 = vpop.f32.mrb[5].mxu1 }
 0x2ad   : > { %1304 = vpow2.f32 %v931_v17 }
 0x2ae   : > { %1306 = vrcp.f32 %v747_v12 }
 0x2af   : > { %1308 = vrcp.f32 %v748_v16 }
 0x2b7   : > { %v1305_v20 = vpop.eup %1304 }
 0x2b8   : > { %v1307_v19 = vpop.eup %1306  ;;  %v933_v21 = vmul.f32 %v1305_v20, %v851_v18 }
 0x2b9   : > { %v1309_v13 = vpop.eup %1308 }
 0x2ba   : > { %v934_v46 = vmul.f32 %v1307_v19, %v933_v21  ;;  %v935_v30 = vmul.f32 %v1309_v13, %v933_v21  ;;  %v936_v24 = vmul.f32 %v1303_v26, %v933_v21  ;;  %v955_v27 = vmul.f32 %v933_v21, %v1542_v34 }
 0x2bb   : > { %v962_v28 = vrot.slane %v933_v21, 4 }
 0x2bc   : > { %v937_v29 = vrot.slane %v934_v46, 4  ;;  %v943_v25 = vrot.slane %v935_v30, 4  ;;  %v949_v31 = vrot.slane %v936_v24, 4  ;;  %v956_v32 = vrot.slane %v955_v27, 4 }
 0x2bd   : > { %v963_v33 = vadd.f32 %v962_v28, %v933_v21 }
 0x2be   : > { %v938_v35 = vadd.f32 %v937_v29, %v934_v46  ;;  %v944_v36 = vadd.f32 %v943_v25, %v935_v30  ;;  %v950_v37 = vadd.f32 %v949_v31, %v936_v24  ;;  %v957_v38 = vadd.f32 %v956_v32, %v955_v27 }
 0x2bf   : > { %v964_v39 = vrot.slane %v963_v33, 2 }
 0x2c0   : > { %v939_v40 = vrot.slane %v938_v35, 2  ;;  %v945_v43 = vrot.slane %v944_v36, 2  ;;  %v951_v44 = vrot.slane %v950_v37, 2  ;;  %v958_v45 = vrot.slane %v957_v38, 2 }
 0x2c1   : > { %v965_v47 = vadd.f32 %v964_v39, %v963_v33 }
 0x2c2   : > { %v940_v48 = vadd.f32 %v939_v40, %v938_v35  ;;  %v946_v34 = vadd.f32 %v945_v43, %v944_v36  ;;  %v952_v41 = vadd.f32 %v951_v44, %v950_v37  ;;  %v959_v49 = vadd.f32 %v958_v45, %v957_v38 }
 0x2c3   : > { %v966_v51 = vrot.slane %v965_v47, 1 }
 0x2c4   : > { %v941_v52 = vrot.slane %v940_v48, 1  ;;  %v947_v53 = vrot.slane %v946_v34, 1  ;;  %v953_v54 = vrot.slane %v952_v41, 1  ;;  %v960_v55 = vrot.slane %v959_v49, 1 }
 0x2c5   : > { %v967_v23 = vadd.f32 %v966_v51, %v965_v47 }
 0x2c6   : > { %v942_v56 = vadd.f32 %v941_v52, %v940_v48  ;;  %v948_v57 = vadd.f32 %v947_v53, %v946_v34  ;;  %v954_v58 = vadd.f32 %v953_v54, %v952_v41  ;;  %v961_v59 = vadd.f32 %v960_v55, %v959_v49 }
 0x2c7   : > { %978 = vst [vmem:[%s1687_s17 + $0x4] sm:$0x1] %v967_v23 }
 0x2c8   : > { %v972_v60 = vsel %vm971_vm8, %v948_v57, %v942_v56  ;;  %977 = vst [vmem:[%s1687_s17 + $0x3] sm:$0x1] %v961_v59 }
 0x2c9   : > { %v974_v42 = vsel %vm973_vm9, %v954_v58, %v972_v60 }
 0x2ca   : > { %976 = vst [vmem:[%s1687_s17] sm:$0x7] %v974_v42 }
 0x2cb   : > { %1323 = shalt.err (!%p1320_p5)
}
 0x2cc   : > { %s1324_s13 = scalar_lea.hbm %s1698_s28, 128  ;;  %s1328_s16 = scalar_lea.hbm %s1754_s6, 256 }
 0x2cd   : > { %p1325_p6 = scmp.ne.s32.totalorder %s1698_s28, %s1324_s13  ;;  %p1329_p10 = scmp.lt.u32.totalorder %s1698_s28, %s1754_s6 }
 0x2ce   : > { %p1330_p11 = scmp.lt.u32.totalorder %s1328_s16, %s1324_s13  ;;  %p1332_p13 = scmp.lt.u32.totalorder %s1324_s13, %s1698_s28 }
 0x2cf   : > { %p1326_p7 = pnand %p1325_p6, %p1472_p4 }
 0x2d0   : > { %p1331_p12 = por %p1330_p11, %p1329_p10 }
 0x2d1   : > { %p1327_p9 = pneg %p1326_p7 }
 0x2d2   : > { %p1333_p0 = por %p1332_p13, %p1331_p12 }
 0x2d4   : > { %p1334_p1 = pnand %p1333_p0, %p1327_p9 }
 0x2d6   : > { %1337 = shalt.err (!%p1334_p1)
}
 0x2d7   : > { %1222 = dma.vmem_to_hbm [thread:$0]  (%p1472_p4), %s1700_s19, 128, %s1698_s28, %s981_s24  }
 0x2d8 PF: > { %p1228_p2 = scmp.ge.s32.totalorder %s1388_s26, 2  ;;  %s1007_s20 = sand.u32 1, %s1368_s21  }
 0x2d9   : > { %s1008_s27 = scalar_lea.sflag [#allocation3], %s1007_s20 }
 0x2da   : > { %p1225_p3 = pnand %p1228_p2, %p1479_p8 }
 0x2dc   : > { %1363 = dma.done.wait (!%p1225_p3), %s1008_s27, 128  }
 0x2dd   : > { %1365 = vsyncadd (!%p1225_p3), %s1008_s27, 4294967168  ;;  %s19_s26 = sadd.s32 1, %s1388_s26   ;;  %s1757_s21 = smov %s1372_s22 }
 0x2de   : > { %p16_p5 = scmp.ge.s32.totalorder %s19_s26, 4   ;;  %s1758_s22 = smov %s1376_s23 }
 0x2df   : > { %s1759_s23 = smov %s1485_s10  ;;  %s1760_s24 = smov %s1384_s25 }
 0x2e0   : > { %s1761_s25 = smov %s1763_s29  ;;  %18 = sbr.rel (!%p16_p5) target bundleno = 4 (0x4), region = 85 }
 0x2e7   :  { %1013 = vsyncpa [#allocation3], 1 }
 0x2e8   :  { %1015 = vsyncpa [#allocation3 + $0x1], 1 }

</bundles_post_ra>
